<compile_context>
chip_gen: v6e
topology: v6e:2x2x1
jax: 0.10.0
libtpu: 0.0.40
codegen_flags: <defaults>
</compile_context>

<pallas_src>
import functools

import jax
import jax.numpy as jnp
from jax.experimental import pallas as pl
from jax.experimental.pallas import tpu as pltpu

_LANES = 128
_MAX_BLOCK_ROWS = 2048   # 2048 x 128 x 4B = 1 MiB per f32 input block
_ROW_ALIGN = 32          # sublane alignment valid for f32 / bf16 / int8 inputs
_NCORES = 2              # leading "parallel" axis; uses both TCs on v7x


def _cdiv(a, b):
    return -(-a // b)


def _focal_kernel(x_ref, t_ref, o_ref, *, alpha, gamma, use_gamma_dict,
                  rows_valid, block_rows, blocks_per_core, full_blocks):
    c = pl.program_id(0)                 # core / parallel axis
    i = pl.program_id(1)                 # reduction axis
    gblk = c * blocks_per_core + i       # logical (un-clamped) block index

    @pl.when(i == 0)
    def _():
        o_ref[...] = jnp.zeros((8, _LANES), jnp.float32)

    # Stream native dtype; do the widening cast in-kernel.
    x = x_ref[...].astype(jnp.float32)
    t = t_ref[...].astype(jnp.float32)

    # Share one exp between sigmoid and the numerically-stable BCE-with-logits.
    e = jnp.exp(-jnp.abs(x))                          # exp(-|x|)
    ce = jnp.maximum(x, 0.0) - x * t + jnp.log1p(e)
    r = 1.0 / (1.0 + e)                               # exact divide (not approx)
    p = jnp.where(x >= 0, r, e * r)                   # == sigmoid(x)

    p_t = p * t + (1.0 - p) * (1.0 - t)
    one_m_pt = 1.0 - p_t

    if use_gamma_dict:
        g = jnp.where(p_t <= 0.2, 5.0, jnp.where(p_t <= 0.5, 3.0, gamma))
        mod = one_m_pt ** g
    elif float(gamma) == 2.0:
        mod = one_m_pt * one_m_pt                     # avoid exp/log for default
    else:
        mod = one_m_pt ** gamma
    loss = ce * mod

    if alpha >= 0:
        loss = (alpha * t + (1.0 - alpha) * (1.0 - t)) * loss

    # Fully in-bounds blocks: mask-free VALU accumulate into the resident
    # (8,128) output block (vreg-tile-aligned reshape -> no relayout).
    @pl.when(gblk < full_blocks)
    def _():
        o_ref[...] += loss.reshape(block_rows // 8, 8, _LANES).sum(axis=0)

    # Ragged last block / duplicated out-of-range grid points: mask by global
    # row index (fits int32 for any realistic element count).
    @pl.when(gblk >= full_blocks)
    def _():
        row = jax.lax.broadcasted_iota(jnp.int32, (block_rows, _LANES), 0)
        ok = (gblk * block_rows + row) < rows_valid
        masked = jnp.where(ok, loss, 0.0)
        o_ref[...] += masked.reshape(block_rows // 8, 8, _LANES).sum(axis=0)


def sigmoidal_focal_loss(inputs, targets, *, alpha=0.25, gamma=2.0,
                         reduction='mean', label_smoothing=0.0,
                         use_gamma_dict=False):
    """JAX/Pallas equivalent of SigmoidalFocalLoss.forward (mean/sum reduction)."""
    # TODO(synk): label_smoothing > 0 uses nn.CrossEntropyLoss (softmax CE over
    # classes), a different op; not implemented here.
    assert label_smoothing == 0.0, "label_smoothing > 0 path not implemented"
    # TODO(synk): reduction='none' (unreduced per-element output) not implemented.
    assert reduction in ('mean', 'sum'), "reduction='none' not implemented"
    assert inputs.shape == targets.shape

    x = inputs.reshape(-1)        # free reshape, native dtype (no astype pass)
    t = targets.reshape(-1)
    n = x.shape[0]

    # Only non-lane-aligned inputs pay a pad, and only up to the next multiple
    # of 128, using identity values whose per-element loss is exactly 0 in f32
    # (ce == 0 and (1 - p_t)**gamma == 0) -> no per-element masking needed.
    pad = (-n) % _LANES
    if pad:
        x = jnp.concatenate([x, jnp.full((pad,), 1e4, dtype=x.dtype)])
        t = jnp.concatenate([t, jnp.full((pad,), 1, dtype=t.dtype)])
    rows = (n + pad) // _LANES
    x2 = x.reshape(rows, _LANES)  # free
    t2 = t.reshape(rows, _LANES)

    rows_per_core = _cdiv(rows, _NCORES)
    block_rows = min(_MAX_BLOCK_ROWS, _cdiv(rows_per_core, _ROW_ALIGN) * _ROW_ALIGN)
    total_blocks = _cdiv(rows, block_rows)
    bpc = _cdiv(total_blocks, _NCORES)        # blocks per core
    last_blk = total_blocks - 1
    full_blocks = rows // block_rows          # # of entirely-valid blocks

    # Clamp the DMA block index so trailing grid points (ragged row split
    # across cores) never read fully out of bounds; the kernel masks them.
    def in_map(c, i):
        return (jnp.minimum(c * bpc + i, last_blk), 0)

    # NOTE: grid/block constants depend on n, so distinct element counts
    # recompile regardless; SMEM-scalar n would not avoid that here.
    kernel = functools.partial(
        _focal_kernel, alpha=float(alpha), gamma=float(gamma),
        use_gamma_dict=use_gamma_dict, rows_valid=rows,
        block_rows=block_rows, blocks_per_core=bpc, full_blocks=full_blocks)

    partials = pl.pallas_call(
        kernel,
        out_shape=jax.ShapeDtypeStruct((_NCORES * 8, _LANES), jnp.float32),
        grid_spec=pltpu.PrefetchScalarGridSpec(
            num_scalar_prefetch=0,
            grid=(_NCORES, bpc),
            in_specs=[
                pl.BlockSpec((block_rows, _LANES), in_map),
                pl.BlockSpec((block_rows, _LANES), in_map),
            ],
            # Per-core lane-dense (8,128) partial-sum block; index is constant
            # along the inner reduction axis -> accumulator output.
            out_specs=pl.BlockSpec((8, _LANES), lambda c, i: (c, 0)),
        ),
        compiler_params=pltpu.CompilerParams(
            dimension_semantics=("parallel", "arbitrary"),
            vmem_limit_bytes=32 * 1024 * 1024),
    )(x2, t2)

    total = jnp.sum(partials)               # tiny final reduce in XLA
    if reduction == 'mean':
        total = total / n                   # mean over the TRUE element count
    return total


def _reference_focal_loss(x, t, alpha, gamma, reduction, use_gamma_dict=False):
    x = x.astype(jnp.float32)
    t = t.astype(jnp.float32)
    p = jax.nn.sigmoid(x)
    ce = jnp.maximum(x, 0.0) - x * t + jnp.log1p(jnp.exp(-jnp.abs(x)))
    p_t = p * t + (1.0 - p) * (1.0 - t)
    if use_gamma_dict:
        g = jnp.where(p_t <= 0.2, 5.0, jnp.where(p_t <= 0.5, 3.0, gamma))
    else:
        g = gamma
    loss = ce * (1.0 - p_t) ** g
    if alpha >= 0:
        loss = (alpha * t + (1.0 - alpha) * (1.0 - t)) * loss
    return loss.mean() if reduction == 'mean' else loss.sum()


if __name__ == "__main__":
    key = jax.random.PRNGKey(0)
    k1, k2, k3, k4, k5, k6 = jax.random.split(key, 6)

    # Test 1: default config (mean), lane-aligned f32 input -> zero-copy path.
    shape1 = (2, 4, 16, 16)
    logits1 = jax.random.normal(k1, shape1, dtype=jnp.float32) * 2.0
    targets1 = jax.random.bernoulli(k2, 0.3, shape1).astype(jnp.float32)
    loss1 = jax.block_until_ready(
        sigmoidal_focal_loss(logits1, targets1, alpha=0.25, gamma=2.0,
                             reduction='mean'))
    ref1 = _reference_focal_loss(logits1, targets1, 0.25, 2.0, 'mean')
    assert jnp.allclose(loss1, ref1, rtol=5e-5, atol=1e-6), (loss1, ref1)

    # Test 2: sum reduction, non-lane-aligned count (identity-pad + ragged block).
    shape2 = (3, 5, 7)
    logits2 = jax.random.normal(k3, shape2, dtype=jnp.float32) * 1.5
    targets2 = jax.random.bernoulli(k4, 0.5, shape2).astype(jnp.float32)
    loss2 = jax.block_until_ready(
        sigmoidal_focal_loss(logits2, targets2, alpha=0.25, gamma=2.0,
                             reduction='sum'))
    ref2 = _reference_focal_loss(logits2, targets2, 0.25, 2.0, 'sum')
    assert jnp.allclose(loss2, ref2, rtol=5e-5, atol=1e-5), (loss2, ref2)

    # Test 3: bf16 inputs streamed natively (cast to f32 inside the kernel).
    shape3 = (4, 8, 32)
    logits3 = (jax.random.normal(k5, shape3, dtype=jnp.float32) * 2.0
               ).astype(jnp.bfloat16)
    targets3 = jax.random.bernoulli(k6, 0.4, shape3).astype(jnp.bfloat16)
    loss3 = jax.block_until_ready(
        sigmoidal_focal_loss(logits3, targets3, alpha=0.25, gamma=2.0,
                             reduction='mean'))
    ref3 = _reference_focal_loss(logits3, targets3, 0.25, 2.0, 'mean')
    assert jnp.allclose(loss3, ref3, rtol=1e-4, atol=1e-6), (loss3, ref3)

    # Test 4: UseGammaDict per-element gamma branch.
    loss4 = jax.block_until_ready(
        sigmoidal_focal_loss(logits1, targets1, alpha=0.25, gamma=2.0,
                             reduction='mean', use_gamma_dict=True))
    ref4 = _reference_focal_loss(logits1, targets1, 0.25, 2.0, 'mean',
                                 use_gamma_dict=True)
    assert jnp.allclose(loss4, ref4, rtol=5e-5, atol=1e-6), (loss4, ref4)

    print("KERNEL_OK")
</pallas_src>

<mosaic_0001>
module attributes {stable_mosaic.version = 11 : i64} {
  func.func @_focal_kernel(%arg0: i32, %arg1: i32, %arg2: memref<32x128xf32, #tpu.memory_space<vmem>>, %arg3: memref<32x128xf32, #tpu.memory_space<vmem>>, %arg4: memref<8x128xf32, #tpu.memory_space<vmem>>) attributes {dimension_semantics = [#tpu.dimension_semantics<parallel>, #tpu.dimension_semantics<arbitrary>], iteration_bounds = array<i64: 2, 1>, scalar_prefetch = 0 : i64, scratch_operands = 0 : i64, tpu.core_type = #tpu.core_type<tc>, window_params = [{transform_indices = @transform_0, window_bounds = array<i64: 32, 128>}, {transform_indices = @transform_1, window_bounds = array<i64: 32, 128>}, {transform_indices = @transform_2, window_bounds = array<i64: 8, 128>}]} {
    %c1_i32 = arith.constant 1 : i32
    %0 = arith.muli %arg0, %c1_i32 : i32
    %1 = arith.addi %0, %arg1 : i32
    %c0_i32 = arith.constant 0 : i32
    %2 = arith.cmpi eq, %arg1, %c0_i32 : i32
    %3 = arith.extui %2 : i1 to i32
    %c0_i32_0 = arith.constant 0 : i32
    %4 = arith.cmpi ne, %3, %c0_i32_0 : i32
    scf.if %4 {
      %cst_18 = arith.constant 0.000000e+00 : f32
      %50 = vector.broadcast %cst_18 : f32 to vector<8x128xf32>
      %c0_19 = arith.constant 0 : index
      %c0_20 = arith.constant 0 : index
      %51 = vector.load %arg4[%c0_19, %c0_20] : memref<8x128xf32, #tpu.memory_space<vmem>>, vector<8x128xf32>
      tpu.vector_store %arg4[%c0_19, %c0_20], %50 {strides = array<i32>} : memref<8x128xf32, #tpu.memory_space<vmem>>, vector<8x128xf32>,
    } else {
    }
    %c0 = arith.constant 0 : index
    %c0_1 = arith.constant 0 : index
    %5 = vector.load %arg2[%c0, %c0_1] : memref<32x128xf32, #tpu.memory_space<vmem>>, vector<32x128xf32>
    %c0_2 = arith.constant 0 : index
    %c0_3 = arith.constant 0 : index
    %6 = vector.load %arg3[%c0_2, %c0_3] : memref<32x128xf32, #tpu.memory_space<vmem>>, vector<32x128xf32>
    %7 = math.absf %5 : vector<32x128xf32>
    %cst = arith.constant 0.000000e+00 : f32
    %8 = vector.broadcast %cst : f32 to vector<32x128xf32>
    %9 = arith.subf %8, %7 : vector<32x128xf32>
    %10 = math.exp %9 : vector<32x128xf32>
    %cst_4 = arith.constant 0.000000e+00 : f32
    %11 = vector.broadcast %cst_4 : f32 to vector<32x128xf32>
    %12 = arith.maximumf %5, %11 : vector<32x128xf32>
    %13 = arith.mulf %5, %6 : vector<32x128xf32>
    %14 = arith.subf %12, %13 : vector<32x128xf32>
    %15 = math.log1p %10 : vector<32x128xf32>
    %16 = arith.addf %14, %15 : vector<32x128xf32>
    %cst_5 = arith.constant 1.000000e+00 : f32
    %17 = vector.broadcast %cst_5 : f32 to vector<32x128xf32>
    %18 = arith.addf %17, %10 : vector<32x128xf32>
    %cst_6 = arith.constant 1.000000e+00 : f32
    %19 = vector.broadcast %cst_6 : f32 to vector<32x128xf32>
    %20 = arith.divf %19, %18 : vector<32x128xf32>
    %cst_7 = arith.constant 0.000000e+00 : f32
    %21 = vector.broadcast %cst_7 : f32 to vector<32x128xf32>
    %22 = arith.cmpf oge, %5, %21 : vector<32x128xf32>
    %23 = arith.mulf %10, %20 : vector<32x128xf32>
    %24 = arith.select %22, %20, %23 : vector<32x128xi1>, vector<32x128xf32>
    %25 = arith.mulf %24, %6 : vector<32x128xf32>
    %cst_8 = arith.constant 1.000000e+00 : f32
    %26 = vector.broadcast %cst_8 : f32 to vector<32x128xf32>
    %27 = arith.subf %26, %24 : vector<32x128xf32>
    %cst_9 = arith.constant 1.000000e+00 : f32
    %28 = vector.broadcast %cst_9 : f32 to vector<32x128xf32>
    %29 = arith.subf %28, %6 : vector<32x128xf32>
    %30 = arith.mulf %27, %29 : vector<32x128xf32>
    %31 = arith.addf %25, %30 : vector<32x128xf32>
    %cst_10 = arith.constant 1.000000e+00 : f32
    %32 = vector.broadcast %cst_10 : f32 to vector<32x128xf32>
    %33 = arith.subf %32, %31 : vector<32x128xf32>
    %34 = arith.mulf %33, %33 : vector<32x128xf32>
    %35 = arith.mulf %16, %34 : vector<32x128xf32>
    %cst_11 = arith.constant 2.500000e-01 : f32
    %36 = vector.broadcast %cst_11 : f32 to vector<32x128xf32>
    %37 = arith.mulf %36, %6 : vector<32x128xf32>
    %cst_12 = arith.constant 1.000000e+00 : f32
    %38 = vector.broadcast %cst_12 : f32 to vector<32x128xf32>
    %39 = arith.subf %38, %6 : vector<32x128xf32>
    %cst_13 = arith.constant 7.500000e-01 : f32
    %40 = vector.broadcast %cst_13 : f32 to vector<32x128xf32>
    %41 = arith.mulf %40, %39 : vector<32x128xf32>
    %42 = arith.addf %37, %41 : vector<32x128xf32>
    %43 = arith.mulf %42, %35 : vector<32x128xf32>
    %c0_i32_14 = arith.constant 0 : i32
    %44 = arith.cmpi slt, %1, %c0_i32_14 : i32
    %45 = arith.extui %44 : i1 to i32
    %c0_i32_15 = arith.constant 0 : i32
    %46 = arith.cmpi ne, %45, %c0_i32_15 : i32
    scf.if %46 {
      %c0_18 = arith.constant 0 : index
      %c0_19 = arith.constant 0 : index
      %50 = vector.load %arg4[%c0_18, %c0_19] : memref<8x128xf32, #tpu.memory_space<vmem>>, vector<8x128xf32>
      %51 = vector.shape_cast %43 : vector<32x128xf32> to vector<4x8x128xf32>
      %cst_20 = arith.constant dense<0.000000e+00> : vector<8x128xf32>
      %52 = vector.multi_reduction <add>, %51, %cst_20 [0] : vector<4x8x128xf32> to vector<8x128xf32>
      %53 = arith.addf %50, %52 : vector<8x128xf32>
      %c0_21 = arith.constant 0 : index
      %c0_22 = arith.constant 0 : index
      %54 = vector.load %arg4[%c0_21, %c0_22] : memref<8x128xf32, #tpu.memory_space<vmem>>, vector<8x128xf32>
      tpu.vector_store %arg4[%c0_21, %c0_22], %53 {strides = array<i32>} : memref<8x128xf32, #tpu.memory_space<vmem>>, vector<8x128xf32>,
    } else {
    }
    %c0_i32_16 = arith.constant 0 : i32
    %47 = arith.cmpi sge, %1, %c0_i32_16 : i32
    %48 = arith.extui %47 : i1 to i32
    %c0_i32_17 = arith.constant 0 : i32
    %49 = arith.cmpi ne, %48, %c0_i32_17 : i32
    scf.if %49 {
      %50 = tpu.iota {dimensions = array<i32: 0>} : vector<32x128xi32>
      %c32_i32 = arith.constant 32 : i32
      %51 = arith.muli %1, %c32_i32 : i32
      %52 = vector.broadcast %51 : i32 to vector<32x128xi32>
      %53 = arith.addi %52, %50 : vector<32x128xi32>
      %c16_i32 = arith.constant 16 : i32
      %54 = vector.broadcast %c16_i32 : i32 to vector<32x128xi32>
      %55 = arith.cmpi slt, %53, %54 : vector<32x128xi32>
      %cst_18 = arith.constant 0.000000e+00 : f32
      %56 = vector.broadcast %cst_18 : f32 to vector<32x128xf32>
      %57 = arith.select %55, %43, %56 : vector<32x128xi1>, vector<32x128xf32>
      %c0_19 = arith.constant 0 : index
      %c0_20 = arith.constant 0 : index
      %58 = vector.load %arg4[%c0_19, %c0_20] : memref<8x128xf32, #tpu.memory_space<vmem>>, vector<8x128xf32>
      %59 = vector.shape_cast %57 : vector<32x128xf32> to vector<4x8x128xf32>
      %cst_21 = arith.constant dense<0.000000e+00> : vector<8x128xf32>
      %60 = vector.multi_reduction <add>, %59, %cst_21 [0] : vector<4x8x128xf32> to vector<8x128xf32>
      %61 = arith.addf %58, %60 : vector<8x128xf32>
      %c0_22 = arith.constant 0 : index
      %c0_23 = arith.constant 0 : index
      %62 = vector.load %arg4[%c0_22, %c0_23] : memref<8x128xf32, #tpu.memory_space<vmem>>, vector<8x128xf32>
      tpu.vector_store %arg4[%c0_22, %c0_23], %61 {strides = array<i32>} : memref<8x128xf32, #tpu.memory_space<vmem>>, vector<8x128xf32>,
    } else {
    }
    return
  }
  func.func @transform_0(%arg0: i32, %arg1: i32) -> (i32, i32) {
    %c1_i32 = arith.constant 1 : i32
    %0 = arith.muli %arg0, %c1_i32 : i32
    %1 = arith.addi %0, %arg1 : i32
    %c0_i32 = arith.constant 0 : i32
    %2 = arith.minsi %1, %c0_i32 : i32
    %c0_i32_0 = arith.constant 0 : i32
    %c0_i32_1 = arith.constant 0 : i32
    return %2, %c0_i32_0 : i32, i32
  }
  func.func @transform_1(%arg0: i32, %arg1: i32) -> (i32, i32) {
    %c1_i32 = arith.constant 1 : i32
    %0 = arith.muli %arg0, %c1_i32 : i32
    %1 = arith.addi %0, %arg1 : i32
    %c0_i32 = arith.constant 0 : i32
    %2 = arith.minsi %1, %c0_i32 : i32
    %c0_i32_0 = arith.constant 0 : i32
    %c0_i32_1 = arith.constant 0 : i32
    return %2, %c0_i32_0 : i32, i32
  }
  func.func @transform_2(%arg0: i32, %arg1: i32) -> (i32, i32) {
    %c0_i32 = arith.constant 0 : i32
    %c0_i32_0 = arith.constant 0 : i32
    return %arg0, %c0_i32 : i32, i32
  }
}

</mosaic_0001>

<bundles_post_ra>
// kernel: tpu_custom_call.1
= control target key start
LH: loop header
LB: loop body
LE: loop exit
PB: predicated region body
PF: predicated region fallthrough
CT: control target
= control target key end

     0   :  { %7 = vsyncpa [#allocation3], 0  ;;  %s1187_s0 = inlined_call_operand.hbm [shape: f32[16,128], index: 0, kind: input, shape index: {}]   ;;  %s1188_s1 = inlined_call_operand.hbm [shape: f32[16,128], index: 1, kind: input, shape index: {}]   ;;  %s1189_s2 = inlined_call_operand.hbm [shape: f32[16,128], index: 2, kind: output, shape index: {}]  }
   0x1   :  { %9 = vsyncpa [#allocation3 + $0x1], 0 }
   0x2   :  { %10 = vsyncpa [#allocation6], 0 }
   0x3   :  { %12 = vsyncpa [#allocation6 + $0x1], 0 }
   0x4   :  { %13 = vsyncpa [#allocation4], 0 }
   0x5   :  { %15 = vsyncpa [#allocation4 + $0x1], 0  ;;  %s887_s9 = smov 0   ;;  %s889_s10 = smov 0  }
   0x6   :  { %s891_s11 = smov 0   ;;  %s893_s12 = smov 0  }
   0x7   :  { %s895_s13 = smov 0   ;;  %s897_s14 = smov 0  }
   0x8   :  { %s899_s15 = smov 0   ;;  %s901_s16 = smov 0  }
   0x9 LB: > { %s560_s17 = sadd.s32 4294967295, %s862_s16   ;;  %s561_s18 = sadd.s32 4294967294, %s862_s16   ;;  %s862_s16 = sphi %s901_s16, %s21_s16   ;;  %s858_s15 = sphi %s899_s15, %s1209_s15   ;;  %s854_s14 = sphi %s897_s14, %s1208_s14   ;;  %s850_s13 = sphi %s895_s13, %s1177_s13   ;;  %s846_s12 = sphi %s893_s12, %s1207_s12   ;;  %s842_s11 = sphi %s891_s11, %s1206_s11   ;;  %s838_s10 = sphi %s889_s10, %s1205_s10   ;;  %s834_s9 = sphi %s887_s9, %s1204_s9  }
   0xa   : > { %s33_s19 = sadd.s32 1, %s858_s15  ;;  %p831_p1 = scmp.ne.s32.totalorder %s850_s13, 0 }
   0xb   : > { %p35_p0 = scmp.ge.s32.totalorder %s33_s19, 2  ;;  %p54_p2 = scmp.eq.s32.totalorder %s862_s16, 0 }
   0xc   : > { %p59_p3 = scmp.ne.s32.totalorder %s850_s13, %s846_s12  ;;  %p60_p5 = scmp.eq.s32.totalorder %s560_s17, 0 }
   0xd   : > { %s1211_s19 = smov (%p35_p0, %s33_s19), 0  ;;  %p933_p4 = por %p831_p1, %p54_p2 }
   0xe   : > { %p937_p6 = por %p60_p5, %p59_p3  ;;  %s101_s22 = ssub.s32 %s858_s15, %s1211_s19 }
   0xf   : > { %p102_p7 = scmp.eq.s32.totalorder %s101_s22, 0  ;;  %s104_s23 = sadd.s32 1, %s842_s11 }
  0x10   : > { %p114_p8 = scmp.ne.s32.totalorder %s842_s11, %s838_s10  ;;  %p115_p9 = scmp.eq.s32.totalorder %s560_s17, 1 }
  0x11   : > { %s945_s24 = scalar_select %p102_p7, %s842_s11, %s104_s23  }
  0x12   : > { %p120_p10 = scmp.ne.s32.totalorder %s838_s10, %s834_s9  ;;  %p121_p11 = scmp.eq.s32.totalorder %s561_s18, 1 }
  0x13   : > { %p951_p12 = por %p115_p9, %p114_p8  ;;  %p1190_p0 = scmp.ge.s32.totalorder %s862_s16, 2 }
  0x14   : > { %p955_p13 = por %p121_p11, %p120_p10 }
  0x15   : > { %137 = sbr.rel (%p1190_p0) target bundleno = 72 (0x48), region = 16 }
  0x1a   : > { %140 = sbr.rel (!%p933_p4) target bundleno = 49 (0x31), region = 20 }
  0x1f   : > { %154 = vsyncadd [#allocation3], 256  ;;  %s864_s27 = smov [#allocation2]   ;;  %s701_s3 = scalar_lea.hbm %s1187_s0, 256 }
  0x20   : > { %s159_s28 = sshll.u32 %s864_s27, 4  ;;  %p702_p1 = scmp.ne.s32.totalorder %s1187_s0, %s701_s3  ;;  %s160_s28 = int_to_ptr.vmem [resolvable:$true] %s159_s28 }
  0x21   : > { %p707_p2 = scmp.lt.s32.totalorder %s701_s3, %s701_s3 }
  0x23   : > { %p709_p3 = pnand %p707_p2, %p702_p1 }
  0x25   : > { %712 = shalt.err (!%p709_p3)
}
  0x26   : > { %s713_s6 = scalar_lea.vmem %s160_s28, 256  ;;  %s719_s7 = scalar_lea.vmem %s160_s28, 1024 }
  0x27   : > { %p714_p5 = scmp.ne.s32.totalorder %s160_s28, %s713_s6  ;;  %p720_p7 = scmp.lt.s32.totalorder %s160_s28, %s160_s28 }
  0x28   : > { %p721_p8 = scmp.lt.s32.totalorder %s719_s7, %s713_s6 }
  0x2a   : > { %p722_p9 = por %p721_p8, %p720_p7 }
  0x2c   : > { %p723_p10 = pnand %p722_p9, %p714_p5 }
  0x2e   : > { %726 = shalt.err (!%p723_p10)
}
  0x2f   : > { %s865_s8 = smov 128   ;;  %s866_s12 = smov 8  }
  0x30   : > { %165 = dma.hbm_to_vmem [thread:$0]  %s1187_s0, 256, %s160_s28, [#allocation3], %s865_s8, %s865_s8, %s866_s12  }
  0x31 PF: > { %168 = sbr.rel (!%p933_p4) target bundleno = 72 (0x48), region = 24 }
  0x36   : > { %182 = vsyncadd [#allocation6], 256  ;;  %s867_s22 = smov [#allocation5]   ;;  %s727_s30 = scalar_lea.hbm %s1188_s1, 256 }
  0x37   : > { %s187_s23 = sshll.u32 %s867_s22, 4  ;;  %p728_p11 = scmp.ne.s32.totalorder %s1188_s1, %s727_s30  ;;  %s188_s23 = int_to_ptr.vmem [resolvable:$true] %s187_s23 }
  0x38   : > { %p733_p1 = scmp.lt.s32.totalorder %s727_s30, %s727_s30 }
  0x3a   : > { %p735_p2 = pnand %p733_p1, %p728_p11 }
  0x3c   : > { %738 = shalt.err (!%p735_p2)
}
  0x3d   : > { %s739_s28 = scalar_lea.vmem %s188_s23, 256  ;;  %s745_s5 = scalar_lea.vmem %s188_s23, 1024 }
  0x3e   : > { %p740_p3 = scmp.ne.s32.totalorder %s188_s23, %s739_s28  ;;  %p746_p5 = scmp.lt.s32.totalorder %s188_s23, %s188_s23 }
  0x3f   : > { %p747_p4 = scmp.lt.s32.totalorder %s745_s5, %s739_s28 }
  0x41   : > { %p748_p7 = por %p747_p4, %p746_p5 }
  0x43   : > { %p749_p8 = pnand %p748_p7, %p740_p3 }
  0x45   : > { %752 = shalt.err (!%p749_p8)
}
  0x46   : > { %s868_s20 = smov 128   ;;  %s869_s6 = smov 8  }
  0x47   : > { %193 = dma.hbm_to_vmem [thread:$0]  %s1188_s1, 256, %s188_s23, [#allocation6], %s868_s20, %s868_s20, %s869_s6  }
  0x48 PF: > { %p578_p9 = scmp.ge.s32.totalorder %s862_s16, 1  ;;  %p195_p10 = scmp.lt.s32.totalorder %s862_s16, 3 }
  0x4a   : > { %p196_p11 = pnand %p578_p9, %p195_p10 }
  0x4b   : > { %s201_s12 = sand.u32 (!%p196_p11), 1, %s850_s13  }
  0x4c   : > { %199 = sbr.rel (%p196_p11) target bundleno = 202 (0xca), region = 28  ;;  %s579_s17 = sshll.u32 (!%p196_p11), %s201_s12, 5 }
  0x4d   : > { %s202_s18 = scalar_lea.sflag (!%p196_p11), [#allocation3], %s201_s12  ;;  %s205_s22 = scalar_lea.vmem (!%p196_p11), [#allocation2], %s579_s17 }
  0x51   : > { %816 = dma.done.wait (%p937_p6), %s202_s18, 512  }
  0x52   : > { %818 = vsyncadd (%p937_p6), %s202_s18, 4294966784  ;;  %s211_s23 = scalar_lea.sflag [#allocation6], %s201_s12  ;;  %s991_s27 = scalar_lea.vmem [#allocation5], %s579_s17 }
  0x53   : > { %820 = dma.done.wait (%p937_p6), %s211_s23, 512  }
  0x54   : > { %822 = vsyncadd (%p937_p6), %s211_s23, 4294966784  ;;  %s237_s29 = sand.u32 1, %s838_s10   ;;  %v870_v0 = vmov 0.0   ;;  %v1003_v1 = vld [vmem:[%s205_s22] sm:$0xff]  ;;  %v1005_v2 = vld [vmem:[%s205_s22 + $0x8] sm:$0xff]  ;;  %p582_p6 = scmp.ge.s32.totalorder %s854_s14, 0 }
  0x55   : > { %s581_s30 = sshll.u32 %s237_s29, 3  ;;  %v1007_v3 = vld [vmem:[%s205_s22 + $0x10] sm:$0xff]  ;;  %v1009_v4 = vld [vmem:[%s205_s22 + $0x18] sm:$0xff]  ;;  %v266_v5 = vand.u32 2147483647, %v1003_v1  ;;  %v1028_v25 = vld [vmem:[%s991_s27] sm:$0xff] }
  0x56   : > { %s1000_s3 = scalar_lea.vmem [#allocation7], %s581_s30  ;;  %v267_v6 = vand.u32 2147483647, %v1005_v2  ;;  %v268_v7 = vand.u32 2147483647, %v1007_v3  ;;  %v1031_v26 = vld [vmem:[%s991_s27 + $0x8] sm:$0xff]  ;;  %v286_v28 = vmul.f32 %v1028_v25, %v1003_v1 }
  0x57   : > { %257 = vst [vmem:[%s1000_s3] sm:$0xff] %v870_v0  ;;  %v269_v8 = vand.u32 2147483647, %v1009_v4  ;;  %v270_v9 = vsub.f32 0.0, %v266_v5  ;;  %v282_v27 = vmax.f32 %v1003_v1, 0.0  ;;  %v1037_v29 = vld [vmem:[%s991_s27 + $0x10] sm:$0xff]  ;;  %v1040_v30 = vld [vmem:[%s991_s27 + $0x18] sm:$0xff]  ;;  %v287_v33 = vmul.f32 %v1031_v26, %v1005_v2 }
  0x58   : > { %v271_v10 = vsub.f32 0.0, %v267_v6  ;;  %v272_v11 = vsub.f32 0.0, %v268_v7  ;;  %v283_v31 = vmax.f32 %v1005_v2, 0.0  ;;  %v284_v32 = vmax.f32 %v1007_v3, 0.0 }
  0x59   : > { %v273_v12 = vsub.f32 0.0, %v269_v8  ;;  %v274_v13 = vmul.f32 1.442695, %v270_v9  ;;  %v285_v34 = vmax.f32 %v1009_v4, 0.0  ;;  %v288_v35 = vmul.f32 %v1037_v29, %v1007_v3 }
  0x5a   : > { %v276_v14 = vmul.f32 1.442695, %v271_v10  ;;  %v278_v15 = vmul.f32 1.442695, %v272_v11  ;;  %v289_v36 = vmul.f32 %v1040_v30, %v1009_v4  ;;  %v1052_v38 = vsub.f32 %v282_v27, %v286_v28 }
  0x5b   : > { %677 = vpow2.f32 %v274_v13  ;;  %v280_v16 = vmul.f32 1.442695, %v273_v12  ;;  %v1056_v41 = vsub.f32 %v283_v31, %v287_v33  ;;  %v1058_v42 = vsub.f32 %v284_v32, %v288_v35 }
  0x5c   : > { %679 = vpow2.f32 %v276_v14  ;;  %v1060_v43 = vsub.f32 %v285_v34, %v289_v36  ;;  %vm346_vm0 = vcmp.ge.f32.partialorder %v1003_v1, 0.0  ;;  %vm347_vm1 = vcmp.ge.f32.partialorder %v1005_v2, 0.0 }
  0x5d   : > { %681 = vpow2.f32 %v278_v15  ;;  %vm348_vm2 = vcmp.ge.f32.partialorder %v1007_v3, 0.0  ;;  %vm349_vm3 = vcmp.ge.f32.partialorder %v1009_v4, 0.0  ;;  %v366_v49 = vsub.f32 1.0, %v1028_v25 }
  0x5e   : > { %683 = vpow2.f32 %v280_v16  ;;  %v367_v54 = vsub.f32 1.0, %v1031_v26  ;;  %v368_v58 = vsub.f32 1.0, %v1037_v29  ;;  %v369_v59 = vsub.f32 1.0, %v1040_v30 }
  0x5f   : > { %v390_v61 = vmul.f32 0.25, %v1028_v25  ;;  %v391_v62 = vmul.f32 0.25, %v1031_v26  ;;  %v1078_v63 = vmul.f32 0.25, %v1037_v29  ;;  %v1081_v0 = vmul.f32 0.25, %v1040_v30 }
  0x60   : > { %v394_v9 = vmul.f32 0.75, %v366_v49 }
  0x68   : > { %v1015_v17 = vpop.eup %677 }
  0x69   : > { %v1017_v18 = vpop.eup %679  ;;  %v294_v20 = vadd.f32 1.0, %v1015_v17  ;;  %v297_v37 = vmul.f32 -0.5, %v1015_v17  ;;  %v300_v47 = vand.u32 2147483647, %v1015_v17 }
  0x6a   : > { %v1019_v19 = vpop.eup %681  ;;  %v303_v22 = vadd.f32 1.0, %v1017_v18  ;;  %v306_v39 = vmul.f32 -0.5, %v1017_v18  ;;  %v309_v48 = vand.u32 2147483647, %v1017_v18 }
  0x6b   : > { %v1022_v21 = vpop.eup %683  ;;  %685 = vlog2.f32 %v294_v20  ;;  %v312_v23 = vadd.f32 1.0, %v1019_v19  ;;  %v315_v40 = vmul.f32 -0.5, %v1019_v19  ;;  %v298_v46 = vadd.f32 1.0, %v297_v37 }
  0x6c   : > { %687 = vlog2.f32 %v303_v22  ;;  %v321_v24 = vadd.f32 1.0, %v1022_v21  ;;  %v324_v44 = vmul.f32 -0.5, %v1022_v21  ;;  %v307_v51 = vadd.f32 1.0, %v306_v39 }
  0x6d   : > { %689 = vlog2.f32 %v312_v23  ;;  %v316_v52 = vadd.f32 1.0, %v315_v40  ;;  %v318_v53 = vand.u32 2147483647, %v1019_v19  ;;  %v327_v57 = vand.u32 2147483647, %v1022_v21 }
  0x6e   : > { %691 = vlog2.f32 %v321_v24  ;;  %v325_v56 = vadd.f32 1.0, %v324_v44  ;;  %v299_v6 = vmul.f32 %v1015_v17, %v298_v46  ;;  %vm1084_vm4 = vcmp.lt.f32.partialorder %v300_v47, 0.0004427343 }
  0x6f   : > { %693 = vrcp.f32 %v294_v20  ;;  %vm1088_vm5 = vcmp.lt.f32.partialorder %v309_v48, 0.0004427343  ;;  %v308_v11 = vmul.f32 %v1017_v18, %v307_v51  ;;  %v317_v12 = vmul.f32 %v1019_v19, %v316_v52 }
  0x70   : > { %695 = vrcp.f32 %v303_v22  ;;  %vm1094_vm6 = vcmp.lt.f32.partialorder %v318_v53, 0.0004427343  ;;  %v326_v20 = vmul.f32 %v1022_v21, %v325_v56  ;;  %vm1100_vm7 = vcmp.lt.f32.partialorder %v327_v57, 0.0004427343 }
  0x71   : > { %697 = vrcp.f32 %v312_v23  ;;  %v395_v47 = vmul.f32 0.75, %v367_v54  ;;  %v397_v57 = vmul.f32 0.75, %v369_v59 }
  0x72   : > { %699 = vrcp.f32 %v321_v24 }
  0x78   : > { %v686_v45 = vpop.eup %685 }
  0x79   : > { %v688_v50 = vpop.eup %687  ;;  %v296_v16 = vmul.f32 0.6931472, %v686_v45 }
  0x7a   : > { %v690_v55 = vpop.eup %689  ;;  %v305_v27 = vmul.f32 0.6931472, %v688_v50  ;;  %v396_v50 = vmul.f32 0.75, %v368_v58 }
  0x7b   : > { %v692_v60 = vpop.eup %691  ;;  %v314_v28 = vmul.f32 0.6931472, %v690_v55  ;;  %v302_v2 = vsel %vm1084_vm4, %v299_v6, %v296_v16  ;;  %v398_v6 = vadd.f32 %v394_v9, %v390_v61 }
  0x7c   : > { %v694_v5 = vpop.eup %693  ;;  %v323_v36 = vmul.f32 0.6931472, %v692_v60  ;;  %v311_v3 = vsel %vm1088_vm5, %v308_v11, %v305_v27  ;;  %v330_v51 = vadd.f32 %v302_v2, %v1052_v38  ;;  %v400_v38 = vadd.f32 %v396_v50, %v1078_v63 }
  0x7d   : > { %v696_v10 = vpop.eup %695  ;;  %v350_v14 = vmul.f32 %v694_v5, %v1015_v17  ;;  %v320_v4 = vsel %vm1094_vm6, %v317_v12, %v314_v28  ;;  %v331_v53 = vadd.f32 %v311_v3, %v1056_v41  ;;  %v401_v41 = vadd.f32 %v397_v57, %v1081_v0 }
  0x7e   : > { %v698_v15 = vpop.eup %697  ;;  %v351_v23 = vmul.f32 %v696_v10, %v1017_v18 }
  0x7f   : > { %v700_v24 = vpop.eup %699  ;;  %v352_v31 = vmul.f32 %v698_v15, %v1019_v19  ;;  %v354_v32 = vsel %vm346_vm0, %v694_v5, %v350_v14 }
  0x80   : > { %v353_v17 = vmul.f32 %v700_v24, %v1022_v21  ;;  %v355_v33 = vsel %vm347_vm1, %v696_v10, %v351_v23  ;;  %v358_v34 = vmul.f32 %v354_v32, %v1028_v25  ;;  %v362_v35 = vsub.f32 1.0, %v354_v32 }
  0x81   : > { %v356_v18 = vsel %vm348_vm2, %v698_v15, %v352_v31  ;;  %v359_v37 = vmul.f32 %v355_v33, %v1031_v26  ;;  %v363_v39 = vsub.f32 1.0, %v355_v33  ;;  %v399_v10 = vadd.f32 %v395_v47, %v391_v62 }
  0x82   : > { %v357_v19 = vsel %vm349_vm3, %v700_v24, %v353_v17  ;;  %v360_v1 = vmul.f32 %v356_v18, %v1037_v29  ;;  %v364_v40 = vsub.f32 1.0, %v356_v18  ;;  %v370_v21 = vmul.f32 %v366_v49, %v362_v35 }
  0x83   : > { %v361_v25 = vmul.f32 %v357_v19, %v1040_v30  ;;  %v365_v44 = vsub.f32 1.0, %v357_v19  ;;  %v371_v45 = vmul.f32 %v367_v54, %v363_v39  ;;  %v329_v49 = vsel %vm1100_vm7, %v326_v20, %v323_v36 }
  0x84   : > { %v372_v46 = vmul.f32 %v368_v58, %v364_v40  ;;  %v374_v26 = vadd.f32 %v370_v21, %v358_v34  ;;  %v332_v54 = vadd.f32 %v320_v4, %v1058_v42  ;;  %v333_v7 = vadd.f32 %v329_v49, %v1060_v43 }
  0x85   : > { %v373_v48 = vmul.f32 %v369_v59, %v365_v44  ;;  %v375_v29 = vadd.f32 %v371_v45, %v359_v37 }
  0x86   : > { %v376_v30 = vadd.f32 %v372_v46, %v360_v1  ;;  %v378_v52 = vsub.f32 1.0, %v374_v26 }
  0x87   : > { %v377_v55 = vadd.f32 %v373_v48, %v361_v25  ;;  %v379_v56 = vsub.f32 1.0, %v375_v29 }
  0x88   : > { %v380_v60 = vsub.f32 1.0, %v376_v30  ;;  %v382_v5 = vmul.f32 %v378_v52, %v378_v52 }
  0x89   : > { %v381_v58 = vsub.f32 1.0, %v377_v55  ;;  %v383_v8 = vmul.f32 %v379_v56, %v379_v56 }
  0x8a   : > { %v384_v11 = vmul.f32 %v380_v60, %v380_v60  ;;  %v386_v12 = vmul.f32 %v382_v5, %v330_v51 }
  0x8b   : > { %v385_v13 = vmul.f32 %v381_v58, %v381_v58  ;;  %v387_v14 = vmul.f32 %v383_v8, %v331_v53  ;;  %409 = sbr.rel (%p582_p6) target bundleno = 153 (0x99), region = 44 }
  0x8c   : > { %v388_v15 = vmul.f32 %v384_v11, %v332_v54  ;;  %v402_v59 = vmul.f32 %v398_v6, %v386_v12 }
  0x8d   : > { %v389_v16 = vmul.f32 %v385_v13, %v333_v7  ;;  %v403_v42 = vmul.f32 %v399_v10, %v387_v14 }
  0x8e   : > { %v404_v20 = vmul.f32 %v400_v38, %v388_v15 }
  0x8f   : > { %v405_v22 = vmul.f32 %v401_v41, %v389_v16 }
  0x90   : > { %v411_v43 = vadd.f32 %v403_v42, %v402_v59  ;;  %v410_v62 = vld [vmem:[%s1000_s3] sm:$0xff] }
  0x92   : > { %v412_v61 = vadd.f32 %v411_v43, %v404_v20 }
  0x94   : > { %v413_v9 = vadd.f32 %v412_v61, %v405_v22 }
  0x96   : > { %v414_v63 = vadd.f32 %v413_v9, %v410_v62 }
  0x98   : > { %415 = vst [vmem:[%s1000_s3] sm:$0xff] %v414_v63 }
  0x99 PF: > { %p583_p1 = scmp.lt.s32.totalorder %s854_s14, 0 }
  0x9a   : > { %s584_s21 = sshll.u32 (!%p583_p1), %s854_s14, 5 }
  0x9b   : > { %419 = sbr.rel (%p583_p1) target bundleno = 179 (0xb3), region = 48 }
  0xa0   : > { %v420_v0 = vlaneseq  ;;  %v426_v23 = vstv %s584_s21  ;;  %v439_v1 = vld [vmem:[%s1000_s3] sm:$0xff] }
  0xa2   : > { %v421_v24 = vshrl.u32 %v420_v0, 7 }
  0xa4   : > { %v422_v27 = vadd.s32 8, %v421_v24  ;;  %v423_v28 = vadd.s32 16, %v421_v24  ;;  %v424_v31 = vadd.s32 24, %v421_v24  ;;  %v427_v32 = vadd.s32 %v426_v23, %v421_v24 }
  0xa6   : > { %v428_v17 = vadd.s32 %v426_v23, %v422_v27  ;;  %v429_v33 = vadd.s32 %v426_v23, %v423_v28  ;;  %v430_v34 = vadd.s32 %v426_v23, %v424_v31  ;;  %vm431_vm8 = vcmp.lt.s32.totalorder %v427_v32, 16 }
  0xa7   : > { %v435_v35 = vsel %vm431_vm8, %v402_v59, 0.0 }
  0xa8   : > { %vm432_vm9 = vcmp.lt.s32.totalorder %v428_v17, 16  ;;  %vm433_vm10 = vcmp.lt.s32.totalorder %v429_v33, 16  ;;  %vm434_vm11 = vcmp.lt.s32.totalorder %v430_v34, 16 }
  0xa9   : > { %v436_v36 = vsel %vm432_vm9, %v403_v42, 0.0  ;;  %v437_v18 = vsel %vm433_vm10, %v404_v20, 0.0  ;;  %v438_v39 = vsel %vm434_vm11, %v405_v22, 0.0 }
  0xaa   : > { %v440_v37 = vadd.f32 %v436_v36, %v435_v35 }
  0xac   : > { %v441_v19 = vadd.f32 %v440_v37, %v437_v18 }
  0xae   : > { %v442_v40 = vadd.f32 %v441_v19, %v438_v39 }
  0xb0   : > { %v443_v21 = vadd.f32 %v442_v40, %v439_v1 }
  0xb2   : > { %444 = vst [vmem:[%s1000_s3] sm:$0xff] %v443_v21 }
  0xb3 PF: > { %s586_s4 = sshll.u32 %s854_s14, 7  ;;  %s459_s6 = sshll.u32 %s1000_s3, 4  ;;  %s460_s6 = int_to_ptr.vmem [resolvable:$true] %s459_s6 }
  0xb4   : > { %s457_s20 = scalar_lea.hbm %s1189_s2, %s586_s4  ;;  %s446_s7 = scalar_lea.sflag [#allocation4], %s237_s29 }
  0xb5   : > { %s753_s8 = scalar_lea.vmem %s460_s6, 128  ;;  %s871_s12 = smov [#allocation7]  }
  0xb6   : > { %p754_p2 = scmp.ne.s32.totalorder %s460_s6, %s753_s8  ;;  %s757_s17 = sshll.u32 %s871_s12, 4  ;;  %s758_s17 = int_to_ptr.vmem [resolvable:$false] %s757_s17 }
  0xb7   : > { %s759_s18 = scalar_lea.vmem %s758_s17, 256  ;;  %p760_p4 = scmp.lt.s32.totalorder %s460_s6, %s758_s17 }
  0xb8   : > { %p755_p3 = pnand %p754_p2, %p951_p12  ;;  %p761_p7 = scmp.lt.s32.totalorder %s759_s18, %s753_s8 }
  0xba   : > { %p756_p5 = pneg %p755_p3  ;;  %p762_p8 = por %p761_p7, %p760_p4 }
  0xbc   : > { %p763_p9 = pnand %p762_p8, %p756_p5 }
  0xbe   : > { %766 = shalt.err (!%p763_p9)
}
  0xbf   : > { %s767_s14 = scalar_lea.hbm %s457_s20, 128  ;;  %s771_s27 = scalar_lea.hbm %s1189_s2, 256 }
  0xc0   : > { %p768_p10 = scmp.ne.s32.totalorder %s457_s20, %s767_s14  ;;  %p772_p1 = scmp.lt.s32.totalorder %s457_s20, %s1189_s2 }
  0xc1   : > { %p773_p2 = scmp.lt.s32.totalorder %s771_s27, %s767_s14 }
  0xc2   : > { %p769_p11 = pnand %p768_p10, %p951_p12 }
  0xc3   : > { %p774_p3 = por %p773_p2, %p772_p1 }
  0xc4   : > { %p770_p6 = pneg %p769_p11 }
  0xc6   : > { %p775_p0 = pnand %p774_p3, %p770_p6 }
  0xc8   : > { %778 = shalt.err (!%p775_p0)
}
  0xc9   : > { %593 = dma.vmem_to_hbm [thread:$0]  (%p951_p12), %s460_s6, 128, %s457_s20, %s446_s7  }
  0xca PF: > { %s471_s3 = sand.u32 1, %s834_s9   ;;  %p1203_p5 = scmp.ge.s32.totalorder %s862_s16, 2 }
  0xcb   : > { %s472_s21 = scalar_lea.sflag [#allocation4], %s471_s3 }
  0xcc   : > { %p596_p4 = pnand %p1203_p5, %p955_p13 }
  0xce   : > { %p597_p7 = pneg %p596_p4 }
  0xd0   : > { %824 = dma.done.wait (%p597_p7), %s472_s21, 128  }
  0xd1   : > { %826 = vsyncadd (%p597_p7), %s472_s21, 4294967168  ;;  %s21_s16 = sadd.s32 1, %s862_s16   ;;  %s1204_s9 = smov %s838_s10 }
  0xd2   : > { %p18_p8 = scmp.ge.s32.totalorder %s21_s16, 4   ;;  %s1205_s10 = smov %s842_s11 }
  0xd3   : > { %s1206_s11 = smov %s945_s24  ;;  %s1207_s12 = smov %s850_s13 }
  0xd4   : > { %s1177_s13 = smov 0   ;;  %s1208_s14 = smov %s858_s15 }
  0xd5   : > { %s1209_s15 = smov %s1211_s19  ;;  %20 = sbr.rel (!%p18_p8) target bundleno = 9 (0x9), region = 98 }
  0xda   :  { %477 = vsyncpa [#allocation3], 1 }
  0xdb   :  { %479 = vsyncpa [#allocation3 + $0x1], 1 }
  0xdc   :  { %480 = vsyncpa [#allocation6], 1 }
  0xdd   :  { %482 = vsyncpa [#allocation6 + $0x1], 1 }
  0xde   :  { %483 = vsyncpa [#allocation4], 1 }
  0xdf   :  { %485 = vsyncpa [#allocation4 + $0x1], 1 }

</bundles_post_ra>
